<compile_context>
chip_gen: v5e
topology: v5e:2x2
jax: 0.10.0
libtpu: 0.0.40
codegen_flags: <defaults>
</compile_context>

<pallas_src>
import functools

import jax
import jax.numpy as jnp
from jax import lax
from jax.experimental import pallas as pl
from jax.experimental.pallas import tpu as pltpu


def _round_up(x, m):
    return ((x + m - 1) // m) * m


def _lstm_gate_math(gates, c_prev, H):
    """LSTM cell gate math (PyTorch i,f,g,o order), f32.

    Fused activations: one sigmoid + one tanh over the full (b, 4H) gate block
    (2 EUP passes), then slice the i/f/o lanes from the sigmoid result and the
    g lanes from the tanh result."""
    sig = jax.nn.sigmoid(gates)
    th = jnp.tanh(gates)
    i_g = sig[:, 0 * H:1 * H]
    f_g = sig[:, 1 * H:2 * H]
    g_g = th[:, 2 * H:3 * H]
    o_g = sig[:, 3 * H:4 * H]
    c_new = f_g * c_prev + i_g * g_g
    h_new = o_g * jnp.tanh(c_new)
    return h_new, c_new


# ----------------------------------------------------------------------------
# Pallas kernel.  Grid = (batch_blocks [parallel], time_chunks [arbitrary]).
# Hidden/cell state is carried across time chunks in VMEM scratch and across
# timesteps within a chunk in registers (fully unrolled step loop).
# ----------------------------------------------------------------------------
def _lstm_encoder_kernel(*refs, num_layers, hidden_size, t_chunk, t_last, n_sub):
    L, H = num_layers, hidden_size
    if L > 1:
        (xg_ref, whh0_ref, wih_r_ref, whh_r_ref, br_ref,
         out_ref, fh_ref, fc_ref, h_scr, c_scr) = refs
    else:
        (xg_ref, whh0_ref, out_ref, fh_ref, fc_ref, h_scr, c_scr) = refs
        wih_r_ref = whh_r_ref = br_ref = None

    s = pl.program_id(1)                     # time-chunk axis (sequential carry)
    n_s = pl.num_programs(1)

    @pl.when(s == 0)
    def _init():
        h_scr[...] = jnp.zeros_like(h_scr)
        c_scr[...] = jnp.zeros_like(c_scr)

    # Resident weights (constant index_map -> fetched from HBM only once).
    whh0 = whh0_ref[...]                                      # (H, 4H) bf16
    w_ih_r = [wih_r_ref[l] for l in range(L - 1)] if L > 1 else []
    w_hh_r = [whh_r_ref[l] for l in range(L - 1)] if L > 1 else []
    b_r = [br_ref[l] for l in range(L - 1)] if L > 1 else []

    Bblk = h_scr.shape[1]
    sb = Bblk // n_sub

    # Carried state -> registers, split into independent batch sub-chains so
    # the scheduler can interleave their serial MXU->EUP dependency chains.
    hs = [[h_scr[l, u * sb:(u + 1) * sb, :] for l in range(L)]
          for u in range(n_sub)]
    cs = [[c_scr[l, u * sb:(u + 1) * sb, :] for l in range(L)]
          for u in range(n_sub)]

    def step(t, hs, cs):
        xg_t = xg_ref[t].astype(jnp.float32)                  # (Bblk, 4H)
        for u in range(n_sub):
            lo, hi = u * sb, (u + 1) * sb
            xg_u = xg_t if n_sub == 1 else xg_t[lo:hi, :]
            # Layer 0: input projection (+bias) was hoisted out of the kernel;
            # only the recurrent matmul sits on the critical path.
            gates = xg_u + jnp.dot(hs[u][0].astype(jnp.bfloat16), whh0,
                                   preferred_element_type=jnp.float32)
            h_l, c_l = _lstm_gate_math(gates, cs[u][0], H)
            hs[u][0], cs[u][0] = h_l, c_l
            inp = h_l
            # Layers >= 1: two independent dots (no per-step lane concat).
            for l in range(1, L):
                gates = (jnp.dot(inp.astype(jnp.bfloat16), w_ih_r[l - 1],
                                 preferred_element_type=jnp.float32)
                         + jnp.dot(hs[u][l].astype(jnp.bfloat16), w_hh_r[l - 1],
                                   preferred_element_type=jnp.float32)
                         + b_r[l - 1])
                h_l, c_l = _lstm_gate_math(gates, cs[u][l], H)
                hs[u][l], cs[u][l] = h_l, c_l
                inp = h_l
            out_ref[t, lo:hi, :] = inp.astype(out_ref.dtype)
        return hs, cs

    # Steps up to (and including) t_last, the local index of the last globally
    # valid timestep in the final chunk (ordinary valid steps on all chunks).
    for t in range(t_last + 1):
        hs, cs = step(t, hs, cs)

    # Snapshot the state at the true last timestep (padding-safe).
    h_snap = [[hs[u][l] for l in range(L)] for u in range(n_sub)]
    c_snap = [[cs[u][l] for l in range(L)] for u in range(n_sub)]

    @pl.when(s == n_s - 1)
    def _finalize():
        for l in range(L):
            for u in range(n_sub):
                lo, hi = u * sb, (u + 1) * sb
                fh_ref[l, lo:hi, :] = h_snap[u][l].astype(fh_ref.dtype)
                fc_ref[l, lo:hi, :] = c_snap[u][l].astype(fc_ref.dtype)

    # Remaining steps of the chunk: valid on every chunk but the last; on the
    # last chunk they are sequence padding, so the tail (and the state carry)
    # is skipped entirely.
    @pl.when(s < n_s - 1)
    def _tail_and_carry():
        th, tcc = hs, cs
        for t in range(t_last + 1, t_chunk):
            th, tcc = step(t, th, tcc)
        for l in range(L):
            for u in range(n_sub):
                lo, hi = u * sb, (u + 1) * sb
                h_scr[l, lo:hi, :] = th[u][l]
                c_scr[l, lo:hi, :] = tcc[u][l]


def lstm_encoder_pallas(x_gates, w_hh0, w_ih_rest, w_hh_rest, b_rest, *,
                        num_layers, hidden_size, t_chunk=32):
    """x_gates: (S, Bp, 4H) bf16 precomputed layer-0 gate contributions.
    w_hh0: (H, 4H) bf16.  w_ih_rest / w_hh_rest: (L-1, H, 4H) bf16 or None.
    b_rest: (L-1, 1, 4H) f32 or None."""
    S, Bp, G = x_gates.shape
    L, H = num_layers, hidden_size
    assert G == 4 * H and Bp % 8 == 0

    # Chunk size: large (amortizes ~0.35us/grid-step overhead); pad S instead
    # of shrinking the chunk to a divisor of S.
    tc = max(1, min(t_chunk, _round_up(S, 8)))
    S_pad = _round_up(S, tc)
    if S_pad != S:
        x_gates = jnp.pad(x_gates, ((0, S_pad - S), (0, 0), (0, 0)))
    n_chunks = S_pad // tc
    t_last = (S - 1) % tc

    # Batch-block grid axis (v7x megacore): only when halves stay 16-row
    # aligned (bf16 sublane packing of the streamed xg blocks).
    n_bblk = 2 if (Bp >= 32 and Bp % 32 == 0) else 1
    Bblk = Bp // n_bblk

    # Independent batch sub-chains inside a block (latency hiding).
    n_sub = 1
    for d in (4, 3, 2):
        if Bblk % d == 0 and (Bblk // d) % 8 == 0:
            n_sub = d
            break

    kernel = functools.partial(_lstm_encoder_kernel, num_layers=L,
                               hidden_size=H, t_chunk=tc, t_last=t_last,
                               n_sub=n_sub)

    in_specs = [
        pl.BlockSpec((tc, Bblk, 4 * H), lambda b, s: (s, b, 0)),   # streamed xg
        pl.BlockSpec((H, 4 * H), lambda b, s: (0, 0)),             # W_hh layer 0
    ]
    inputs = [x_gates, w_hh0]
    if L > 1:
        in_specs += [
            pl.BlockSpec((L - 1, H, 4 * H), lambda b, s: (0, 0, 0)),   # W_ih l>=1
            pl.BlockSpec((L - 1, H, 4 * H), lambda b, s: (0, 0, 0)),   # W_hh l>=1
            pl.BlockSpec((L - 1, 1, 4 * H), lambda b, s: (0, 0, 0)),   # bias l>=1
        ]
        inputs += [w_ih_rest, w_hh_rest, b_rest]

    out_specs = [
        pl.BlockSpec((tc, Bblk, H), lambda b, s: (s, b, 0)),        # per-step out
        pl.BlockSpec((L, Bblk, H), lambda b, s: (0, b, 0)),         # final hiddens
        pl.BlockSpec((L, Bblk, H), lambda b, s: (0, b, 0)),         # final cells
    ]
    out_shapes = (
        jax.ShapeDtypeStruct((S_pad, Bp, H), jnp.float32),
        jax.ShapeDtypeStruct((L, Bp, H), jnp.float32),
        jax.ShapeDtypeStruct((L, Bp, H), jnp.float32),
    )

    # VMEM budget from actual buffer sizes (double-buffered streamed blocks,
    # resident weights, state scratch) plus headroom.
    bytes_needed = (
        2 * (tc * Bblk * 4 * H * 2)                     # xg blocks (bf16)
        + 2 * (tc * Bblk * H * 4)                       # out blocks
        + 2 * 2 * (L * Bblk * H * 4)                    # fh / fc blocks
        + 2 * (H * 4 * H * 2)                           # whh0
        + 2 * max(0, L - 1) * (2 * H * 4 * H * 2 + 4 * H * 4)
        + 2 * (L * Bblk * H * 4)                        # state scratch
    )
    vmem_limit = int(min(64 * 1024 * 1024,
                         max(16 * 1024 * 1024, 2 * bytes_needed)))

    grid_spec = pltpu.PrefetchScalarGridSpec(
        num_scalar_prefetch=0,
        grid=(n_bblk, n_chunks),
        in_specs=in_specs,
        out_specs=out_specs,
        scratch_shapes=[
            pltpu.VMEM((L, Bblk, H), jnp.float32),      # hidden carry
            pltpu.VMEM((L, Bblk, H), jnp.float32),      # cell carry
        ],
    )

    x_out, fh, fc = pl.pallas_call(
        kernel,
        out_shape=out_shapes,
        grid_spec=grid_spec,
        compiler_params=pltpu.CompilerParams(
            dimension_semantics=("parallel", "arbitrary"),
            vmem_limit_bytes=vmem_limit),
    )(*inputs)
    return x_out[:S], fh, fc


# ----------------------------------------------------------------------------
# RecurrentEncoder wrapper (plain-JAX glue: embedding lookup, hoisted layer-0
# input projection, batch padding, padding mask)
# ----------------------------------------------------------------------------
class RecurrentEncoderPallas:
    def __init__(self, vocab_size, pad_token_id=0, hidden_size=32,
                 embedding_size=None, num_layers=1, t_chunk=32, key=None):
        self.vocab_size = vocab_size
        self.pad_token_id = pad_token_id
        self.hidden_size = hidden_size
        self.embedding_size = embedding_size or hidden_size
        self.num_layers = num_layers
        self.output_units = hidden_size
        self.t_chunk = t_chunk

        key = key if key is not None else jax.random.PRNGKey(0)
        k_emb, k_wih, k_whh, k_bih, k_bhh = jax.random.split(key, 5)

        H, E, L = hidden_size, self.embedding_size, num_layers
        bound = 1.0 / (H ** 0.5)

        # nn.Embedding: N(0, 1), padding_idx row zeroed.
        emb = jax.random.normal(k_emb, (vocab_size, E), jnp.float32)
        self.embed_tokens = emb.at[pad_token_id].set(0.0)

        # LSTMCell params, uniform(-1/sqrt(H), 1/sqrt(H)).
        w_ih = [jax.random.uniform(jax.random.fold_in(k_wih, l),
                                   (E if l == 0 else H, 4 * H),
                                   jnp.float32, -bound, bound) for l in range(L)]
        w_hh = [jax.random.uniform(jax.random.fold_in(k_whh, l),
                                   (H, 4 * H), jnp.float32, -bound, bound)
                for l in range(L)]
        b_ih = [jax.random.uniform(jax.random.fold_in(k_bih, l),
                                   (4 * H,), jnp.float32, -bound, bound)
                for l in range(L)]
        b_hh = [jax.random.uniform(jax.random.fold_in(k_bhh, l),
                                   (4 * H,), jnp.float32, -bound, bound)
                for l in range(L)]

        # Layer 0: W_ih only used in the hoisted GEMM; bias folded there too.
        self.w_ih0 = w_ih[0].astype(jnp.bfloat16)               # (E, 4H)
        self.w_hh0 = w_hh[0].astype(jnp.bfloat16)               # (H, 4H)
        self.b0 = (b_ih[0] + b_hh[0]).astype(jnp.float32)       # (4H,)

        if L > 1:
            self.w_ih_rest = jnp.stack(w_ih[1:]).astype(jnp.bfloat16)  # (L-1,H,4H)
            self.w_hh_rest = jnp.stack(w_hh[1:]).astype(jnp.bfloat16)  # (L-1,H,4H)
            self.b_rest = jnp.stack(
                [(b_ih[l] + b_hh[l])[None, :] for l in range(1, L)]
            ).astype(jnp.float32)                                       # (L-1,1,4H)
        else:
            self.w_ih_rest = self.w_hh_rest = self.b_rest = None

    def __call__(self, input_ids):
        # input_ids: (batch, seqlen) int32
        B, S = input_ids.shape
        H, L, E = self.hidden_size, self.num_layers, self.embedding_size

        x = self.embed_tokens[input_ids]                        # (B, S, E); dropout_in p=0
        x = jnp.transpose(x, (1, 0, 2))                         # (S, B, E) time-major

        # Pad batch to a sublane multiple (8).
        Bp = _round_up(B, 8)
        if Bp != B:
            x = jnp.pad(x, ((0, 0), (0, Bp - B), (0, 0)))

        # Hoisted, time-independent layer-0 input projection: one large GEMM
        # (bf16 operands, f32 accumulation), bias folded in; streamed to the
        # kernel in bf16 to halve HBM traffic of the only big streamed array.
        xg = (jnp.dot(x.reshape(S * Bp, E).astype(jnp.bfloat16), self.w_ih0,
                      preferred_element_type=jnp.float32)
              + self.b0).astype(jnp.bfloat16)
        xg = xg.reshape(S, Bp, 4 * H)

        x_out, final_h, final_c = lstm_encoder_pallas(
            xg, self.w_hh0, self.w_ih_rest, self.w_hh_rest, self.b_rest,
            num_layers=L, hidden_size=H, t_chunk=self.t_chunk)

        x_out = x_out[:, :B]
        final_h = final_h[:, :B]
        final_c = final_c[:, :B]
        encoder_padding_mask = (input_ids == self.pad_token_id).T   # (S, B) bool
        return (x_out, final_h, final_c, encoder_padding_mask)


# ----------------------------------------------------------------------------
# Pure-JAX reference (same mixed-precision recipe: bf16 matmul operands,
# bf16-stored layer-0 gate contributions, f32 accumulation / state).
# ----------------------------------------------------------------------------
def reference_forward(enc, input_ids):
    B, S = input_ids.shape
    H, L = enc.hidden_size, enc.num_layers
    x = enc.embed_tokens[input_ids]
    x = jnp.transpose(x, (1, 0, 2))                             # (S, B, E)

    def step(carry, x_t):
        h, c = carry                                            # (L, B, H) each
        new_h, new_c = [], []
        xg_t = (jnp.dot(x_t.astype(jnp.bfloat16), enc.w_ih0,
                        preferred_element_type=jnp.float32) + enc.b0
                ).astype(jnp.bfloat16)
        gates = xg_t.astype(jnp.float32) + jnp.dot(
            h[0].astype(jnp.bfloat16), enc.w_hh0,
            preferred_element_type=jnp.float32)
        h_l, c_l = _lstm_gate_math(gates, c[0], H)
        new_h.append(h_l)
        new_c.append(c_l)
        inp = h_l
        for l in range(1, L):
            gates = (jnp.dot(inp.astype(jnp.bfloat16), enc.w_ih_rest[l - 1],
                             preferred_element_type=jnp.float32)
                     + jnp.dot(h[l].astype(jnp.bfloat16), enc.w_hh_rest[l - 1],
                               preferred_element_type=jnp.float32)
                     + enc.b_rest[l - 1])
            h_l, c_l = _lstm_gate_math(gates, c[l], H)
            new_h.append(h_l)
            new_c.append(c_l)
            inp = h_l
        return (jnp.stack(new_h), jnp.stack(new_c)), inp

    init = (jnp.zeros((L, B, H), jnp.float32), jnp.zeros((L, B, H), jnp.float32))
    (fh, fc), outs = lax.scan(step, init, x)
    mask = (input_ids == enc.pad_token_id).T
    return outs, fh, fc, mask


def _run_case(k_ids, k_params, *, vocab_size, pad_token_id, hidden_size,
              num_layers, batch, seqlen, t_chunk):
    input_ids = jax.random.randint(k_ids, (batch, seqlen), 0, vocab_size, jnp.int32)
    input_ids = input_ids.at[:, -2:].set(pad_token_id)          # non-trivial mask

    enc = RecurrentEncoderPallas(vocab_size, pad_token_id=pad_token_id,
                                 hidden_size=hidden_size, num_layers=num_layers,
                                 t_chunk=t_chunk, key=k_params)

    x_out, final_h, final_c, pad_mask = enc(input_ids)
    jax.block_until_ready((x_out, final_h, final_c, pad_mask))

    assert x_out.shape == (seqlen, batch, hidden_size)
    assert final_h.shape == (num_layers, batch, hidden_size)
    assert final_c.shape == (num_layers, batch, hidden_size)
    assert pad_mask.shape == (seqlen, batch)

    rx, rh, rc, rm = reference_forward(enc, input_ids)
    assert jnp.allclose(x_out, rx, atol=5e-3), "output mismatch"
    assert jnp.allclose(final_h, rh, atol=5e-3), "final_hiddens mismatch"
    assert jnp.allclose(final_c, rc, atol=5e-3), "final_cells mismatch"
    assert jnp.array_equal(pad_mask, rm), "padding mask mismatch"


if __name__ == "__main__":
    key = jax.random.PRNGKey(0)
    k1, k2, k3, k4, k5, k6 = jax.random.split(key, 6)

    # Case 1: module-style defaults at small shapes (single layer, one chunk).
    _run_case(k1, k2, vocab_size=50, pad_token_id=0, hidden_size=32,
              num_layers=1, batch=2, seqlen=8, t_chunk=32)

    # Case 2: two layers (two-dot path), three time chunks (VMEM state carry),
    # padded sequence tail (40 -> 48) with mid-chunk final-state snapshot.
    _run_case(k3, k4, vocab_size=50, pad_token_id=0, hidden_size=32,
              num_layers=2, batch=3, seqlen=40, t_chunk=16)

    # Case 3: batch 32 -> two batch blocks on the parallel grid axis and two
    # independent sub-chains per block; padded chunk (12 -> 16).
    _run_case(k5, k6, vocab_size=50, pad_token_id=0, hidden_size=32,
              num_layers=2, batch=32, seqlen=12, t_chunk=32)

    print("KERNEL_OK")
</pallas_src>

<mosaic_0001>
module attributes {stable_mosaic.version = 11 : i64} {
  func.func @_lstm_encoder_kernel(%arg0: i32, %arg1: i32, %arg2: memref<8x8x128xbf16, #tpu.memory_space<vmem>>, %arg3: memref<32x128xbf16, #tpu.memory_space<vmem>>, %arg4: memref<8x8x32xf32, #tpu.memory_space<vmem>>, %arg5: memref<1x8x32xf32, #tpu.memory_space<vmem>>, %arg6: memref<1x8x32xf32, #tpu.memory_space<vmem>>, %arg7: memref<1x8x32xf32, #tpu.memory_space<vmem>>, %arg8: memref<1x8x32xf32, #tpu.memory_space<vmem>>) attributes {dimension_semantics = [#tpu.dimension_semantics<parallel>, #tpu.dimension_semantics<arbitrary>], iteration_bounds = array<i64: 1, 1>, scalar_prefetch = 0 : i64, scratch_operands = 2 : i64, tpu.core_type = #tpu.core_type<tc>, window_params = [{transform_indices = @transform_0, window_bounds = array<i64: 8, 8, 128>}, {pipeline_mode = #tpu.pipeline_mode<synchronous>, transform_indices = @transform_1, window_bounds = array<i64: 32, 128>}, {transform_indices = @transform_2, window_bounds = array<i64: 8, 8, 32>}, {transform_indices = @transform_3, window_bounds = array<i64: 1, 8, 32>}, {transform_indices = @transform_4, window_bounds = array<i64: 1, 8, 32>}]} {
    %c0_i32 = arith.constant 0 : i32
    %0 = arith.cmpi eq, %arg1, %c0_i32 : i32
    %1 = arith.extui %0 : i1 to i32
    %c0_i32_0 = arith.constant 0 : i32
    %2 = arith.cmpi ne, %1, %c0_i32_0 : i32
    scf.if %2 {
      %cst_68 = arith.constant 0.000000e+00 : f32
      %206 = vector.broadcast %cst_68 : f32 to vector<1x8x32xf32>
      %c0_69 = arith.constant 0 : index
      %c0_70 = arith.constant 0 : index
      %c0_71 = arith.constant 0 : index
      %207 = vector.load %arg7[%c0_69, %c0_70, %c0_71] : memref<1x8x32xf32, #tpu.memory_space<vmem>>, vector<1x8x32xf32>
      tpu.vector_store %arg7[%c0_69, %c0_70, %c0_71], %206 {strides = array<i32>} : memref<1x8x32xf32, #tpu.memory_space<vmem>>, vector<1x8x32xf32>,
      %cst_72 = arith.constant 0.000000e+00 : f32
      %208 = vector.broadcast %cst_72 : f32 to vector<1x8x32xf32>
      %c0_73 = arith.constant 0 : index
      %c0_74 = arith.constant 0 : index
      %c0_75 = arith.constant 0 : index
      %209 = vector.load %arg8[%c0_73, %c0_74, %c0_75] : memref<1x8x32xf32, #tpu.memory_space<vmem>>, vector<1x8x32xf32>
      tpu.vector_store %arg8[%c0_73, %c0_74, %c0_75], %208 {strides = array<i32>} : memref<1x8x32xf32, #tpu.memory_space<vmem>>, vector<1x8x32xf32>,
    } else {
    }
    %c0 = arith.constant 0 : index
    %c0_1 = arith.constant 0 : index
    %3 = vector.load %arg3[%c0, %c0_1] : memref<32x128xbf16, #tpu.memory_space<vmem>>, vector<32x128xbf16>
    %c0_2 = arith.constant 0 : index
    %c0_3 = arith.constant 0 : index
    %c0_4 = arith.constant 0 : index
    %4 = vector.load %arg7[%c0_2, %c0_3, %c0_4] : memref<1x8x32xf32, #tpu.memory_space<vmem>>, vector<1x8x32xf32>
    %5 = vector.shape_cast %4 : vector<1x8x32xf32> to vector<8x32xf32>
    %c0_5 = arith.constant 0 : index
    %c0_6 = arith.constant 0 : index
    %c0_7 = arith.constant 0 : index
    %6 = vector.load %arg8[%c0_5, %c0_6, %c0_7] : memref<1x8x32xf32, #tpu.memory_space<vmem>>, vector<1x8x32xf32>
    %7 = vector.shape_cast %6 : vector<1x8x32xf32> to vector<8x32xf32>
    %c0_8 = arith.constant 0 : index
    %c0_9 = arith.constant 0 : index
    %c0_10 = arith.constant 0 : index
    %8 = vector.load %arg2[%c0_8, %c0_9, %c0_10] : memref<8x8x128xbf16, #tpu.memory_space<vmem>>, vector<1x8x128xbf16>
    %9 = vector.shape_cast %8 : vector<1x8x128xbf16> to vector<8x128xbf16>
    %10 = arith.extf %9 : vector<8x128xbf16> to vector<8x128xf32>
    %11 = arith.truncf %5 : vector<8x32xf32> to vector<8x32xbf16>
    %cst = arith.constant dense<0.000000e+00> : vector<8x128xf32>
    %12 = tpu.matmul %11, %3, %cst {dimension_numbers = #tpu.dot_dimension_numbers<[1], [0], [0], [1], [0, 0, 1, 1], [], []>} : vector<8x32xbf16>, vector<32x128xbf16>, vector<8x128xf32> -> vector<8x128xf32>
    %13 = arith.addf %10, %12 : vector<8x128xf32>
    %14 = arith.negf %13 : vector<8x128xf32>
    %15 = math.exp %14 : vector<8x128xf32>
    %cst_11 = arith.constant 1.000000e+00 : f32
    %16 = vector.broadcast %cst_11 : f32 to vector<8x128xf32>
    %17 = arith.addf %16, %15 : vector<8x128xf32>
    %18 = arith.divf %16, %17 : vector<8x128xf32>
    %19 = math.tanh %13 : vector<8x128xf32>
    %20 = vector.extract_strided_slice %18 {offsets = [0, 0], sizes = [8, 32], strides = [1, 1]} : vector<8x128xf32> to vector<8x32xf32>
    %21 = vector.extract_strided_slice %18 {offsets = [0, 32], sizes = [8, 32], strides = [1, 1]} : vector<8x128xf32> to vector<8x32xf32>
    %22 = vector.extract_strided_slice %19 {offsets = [0, 64], sizes = [8, 32], strides = [1, 1]} : vector<8x128xf32> to vector<8x32xf32>
    %23 = vector.extract_strided_slice %18 {offsets = [0, 96], sizes = [8, 32], strides = [1, 1]} : vector<8x128xf32> to vector<8x32xf32>
    %24 = arith.mulf %21, %7 : vector<8x32xf32>
    %25 = arith.mulf %20, %22 : vector<8x32xf32>
    %26 = arith.addf %24, %25 : vector<8x32xf32>
    %27 = math.tanh %26 : vector<8x32xf32>
    %28 = arith.mulf %23, %27 : vector<8x32xf32>
    %c0_12 = arith.constant 0 : index
    %c0_13 = arith.constant 0 : index
    %c0_14 = arith.constant 0 : index
    %29 = vector.load %arg4[%c0_12, %c0_13, %c0_14] : memref<8x8x32xf32, #tpu.memory_space<vmem>>, vector<1x8x32xf32>
    %30 = vector.shape_cast %29 : vector<1x8x32xf32> to vector<8x32xf32>
    %31 = vector.shape_cast %28 : vector<8x32xf32> to vector<1x8x32xf32>
    tpu.vector_store %arg4[%c0_12, %c0_13, %c0_14], %31 {strides = array<i32>} : memref<8x8x32xf32, #tpu.memory_space<vmem>>, vector<1x8x32xf32>,
    %c1 = arith.constant 1 : index
    %c0_15 = arith.constant 0 : index
    %c0_16 = arith.constant 0 : index
    %32 = vector.load %arg2[%c1, %c0_15, %c0_16] : memref<8x8x128xbf16, #tpu.memory_space<vmem>>, vector<1x8x128xbf16>
    %33 = vector.shape_cast %32 : vector<1x8x128xbf16> to vector<8x128xbf16>
    %34 = arith.extf %33 : vector<8x128xbf16> to vector<8x128xf32>
    %35 = arith.truncf %28 : vector<8x32xf32> to vector<8x32xbf16>
    %cst_17 = arith.constant dense<0.000000e+00> : vector<8x128xf32>
    %36 = tpu.matmul %35, %3, %cst_17 {dimension_numbers = #tpu.dot_dimension_numbers<[1], [0], [0], [1], [0, 0, 1, 1], [], []>} : vector<8x32xbf16>, vector<32x128xbf16>, vector<8x128xf32> -> vector<8x128xf32>
    %37 = arith.addf %34, %36 : vector<8x128xf32>
    %38 = arith.negf %37 : vector<8x128xf32>
    %39 = math.exp %38 : vector<8x128xf32>
    %cst_18 = arith.constant 1.000000e+00 : f32
    %40 = vector.broadcast %cst_18 : f32 to vector<8x128xf32>
    %41 = arith.addf %40, %39 : vector<8x128xf32>
    %42 = arith.divf %40, %41 : vector<8x128xf32>
    %43 = math.tanh %37 : vector<8x128xf32>
    %44 = vector.extract_strided_slice %42 {offsets = [0, 0], sizes = [8, 32], strides = [1, 1]} : vector<8x128xf32> to vector<8x32xf32>
    %45 = vector.extract_strided_slice %42 {offsets = [0, 32], sizes = [8, 32], strides = [1, 1]} : vector<8x128xf32> to vector<8x32xf32>
    %46 = vector.extract_strided_slice %43 {offsets = [0, 64], sizes = [8, 32], strides = [1, 1]} : vector<8x128xf32> to vector<8x32xf32>
    %47 = vector.extract_strided_slice %42 {offsets = [0, 96], sizes = [8, 32], strides = [1, 1]} : vector<8x128xf32> to vector<8x32xf32>
    %48 = arith.mulf %45, %26 : vector<8x32xf32>
    %49 = arith.mulf %44, %46 : vector<8x32xf32>
    %50 = arith.addf %48, %49 : vector<8x32xf32>
    %51 = math.tanh %50 : vector<8x32xf32>
    %52 = arith.mulf %47, %51 : vector<8x32xf32>
    %c1_19 = arith.constant 1 : index
    %c0_20 = arith.constant 0 : index
    %c0_21 = arith.constant 0 : index
    %53 = vector.load %arg4[%c1_19, %c0_20, %c0_21] : memref<8x8x32xf32, #tpu.memory_space<vmem>>, vector<1x8x32xf32>
    %54 = vector.shape_cast %53 : vector<1x8x32xf32> to vector<8x32xf32>
    %55 = vector.shape_cast %52 : vector<8x32xf32> to vector<1x8x32xf32>
    tpu.vector_store %arg4[%c1_19, %c0_20, %c0_21], %55 {strides = array<i32>} : memref<8x8x32xf32, #tpu.memory_space<vmem>>, vector<1x8x32xf32>,
    %c2 = arith.constant 2 : index
    %c0_22 = arith.constant 0 : index
    %c0_23 = arith.constant 0 : index
    %56 = vector.load %arg2[%c2, %c0_22, %c0_23] : memref<8x8x128xbf16, #tpu.memory_space<vmem>>, vector<1x8x128xbf16>
    %57 = vector.shape_cast %56 : vector<1x8x128xbf16> to vector<8x128xbf16>
    %58 = arith.extf %57 : vector<8x128xbf16> to vector<8x128xf32>
    %59 = arith.truncf %52 : vector<8x32xf32> to vector<8x32xbf16>
    %cst_24 = arith.constant dense<0.000000e+00> : vector<8x128xf32>
    %60 = tpu.matmul %59, %3, %cst_24 {dimension_numbers = #tpu.dot_dimension_numbers<[1], [0], [0], [1], [0, 0, 1, 1], [], []>} : vector<8x32xbf16>, vector<32x128xbf16>, vector<8x128xf32> -> vector<8x128xf32>
    %61 = arith.addf %58, %60 : vector<8x128xf32>
    %62 = arith.negf %61 : vector<8x128xf32>
    %63 = math.exp %62 : vector<8x128xf32>
    %cst_25 = arith.constant 1.000000e+00 : f32
    %64 = vector.broadcast %cst_25 : f32 to vector<8x128xf32>
    %65 = arith.addf %64, %63 : vector<8x128xf32>
    %66 = arith.divf %64, %65 : vector<8x128xf32>
    %67 = math.tanh %61 : vector<8x128xf32>
    %68 = vector.extract_strided_slice %66 {offsets = [0, 0], sizes = [8, 32], strides = [1, 1]} : vector<8x128xf32> to vector<8x32xf32>
    %69 = vector.extract_strided_slice %66 {offsets = [0, 32], sizes = [8, 32], strides = [1, 1]} : vector<8x128xf32> to vector<8x32xf32>
    %70 = vector.extract_strided_slice %67 {offsets = [0, 64], sizes = [8, 32], strides = [1, 1]} : vector<8x128xf32> to vector<8x32xf32>
    %71 = vector.extract_strided_slice %66 {offsets = [0, 96], sizes = [8, 32], strides = [1, 1]} : vector<8x128xf32> to vector<8x32xf32>
    %72 = arith.mulf %69, %50 : vector<8x32xf32>
    %73 = arith.mulf %68, %70 : vector<8x32xf32>
    %74 = arith.addf %72, %73 : vector<8x32xf32>
    %75 = math.tanh %74 : vector<8x32xf32>
    %76 = arith.mulf %71, %75 : vector<8x32xf32>
    %c2_26 = arith.constant 2 : index
    %c0_27 = arith.constant 0 : index
    %c0_28 = arith.constant 0 : index
    %77 = vector.load %arg4[%c2_26, %c0_27, %c0_28] : memref<8x8x32xf32, #tpu.memory_space<vmem>>, vector<1x8x32xf32>
    %78 = vector.shape_cast %77 : vector<1x8x32xf32> to vector<8x32xf32>
    %79 = vector.shape_cast %76 : vector<8x32xf32> to vector<1x8x32xf32>
    tpu.vector_store %arg4[%c2_26, %c0_27, %c0_28], %79 {strides = array<i32>} : memref<8x8x32xf32, #tpu.memory_space<vmem>>, vector<1x8x32xf32>,
    %c3 = arith.constant 3 : index
    %c0_29 = arith.constant 0 : index
    %c0_30 = arith.constant 0 : index
    %80 = vector.load %arg2[%c3, %c0_29, %c0_30] : memref<8x8x128xbf16, #tpu.memory_space<vmem>>, vector<1x8x128xbf16>
    %81 = vector.shape_cast %80 : vector<1x8x128xbf16> to vector<8x128xbf16>
    %82 = arith.extf %81 : vector<8x128xbf16> to vector<8x128xf32>
    %83 = arith.truncf %76 : vector<8x32xf32> to vector<8x32xbf16>
    %cst_31 = arith.constant dense<0.000000e+00> : vector<8x128xf32>
    %84 = tpu.matmul %83, %3, %cst_31 {dimension_numbers = #tpu.dot_dimension_numbers<[1], [0], [0], [1], [0, 0, 1, 1], [], []>} : vector<8x32xbf16>, vector<32x128xbf16>, vector<8x128xf32> -> vector<8x128xf32>
    %85 = arith.addf %82, %84 : vector<8x128xf32>
    %86 = arith.negf %85 : vector<8x128xf32>
    %87 = math.exp %86 : vector<8x128xf32>
    %cst_32 = arith.constant 1.000000e+00 : f32
    %88 = vector.broadcast %cst_32 : f32 to vector<8x128xf32>
    %89 = arith.addf %88, %87 : vector<8x128xf32>
    %90 = arith.divf %88, %89 : vector<8x128xf32>
    %91 = math.tanh %85 : vector<8x128xf32>
    %92 = vector.extract_strided_slice %90 {offsets = [0, 0], sizes = [8, 32], strides = [1, 1]} : vector<8x128xf32> to vector<8x32xf32>
    %93 = vector.extract_strided_slice %90 {offsets = [0, 32], sizes = [8, 32], strides = [1, 1]} : vector<8x128xf32> to vector<8x32xf32>
    %94 = vector.extract_strided_slice %91 {offsets = [0, 64], sizes = [8, 32], strides = [1, 1]} : vector<8x128xf32> to vector<8x32xf32>
    %95 = vector.extract_strided_slice %90 {offsets = [0, 96], sizes = [8, 32], strides = [1, 1]} : vector<8x128xf32> to vector<8x32xf32>
    %96 = arith.mulf %93, %74 : vector<8x32xf32>
    %97 = arith.mulf %92, %94 : vector<8x32xf32>
    %98 = arith.addf %96, %97 : vector<8x32xf32>
    %99 = math.tanh %98 : vector<8x32xf32>
    %100 = arith.mulf %95, %99 : vector<8x32xf32>
    %c3_33 = arith.constant 3 : index
    %c0_34 = arith.constant 0 : index
    %c0_35 = arith.constant 0 : index
    %101 = vector.load %arg4[%c3_33, %c0_34, %c0_35] : memref<8x8x32xf32, #tpu.memory_space<vmem>>, vector<1x8x32xf32>
    %102 = vector.shape_cast %101 : vector<1x8x32xf32> to vector<8x32xf32>
    %103 = vector.shape_cast %100 : vector<8x32xf32> to vector<1x8x32xf32>
    tpu.vector_store %arg4[%c3_33, %c0_34, %c0_35], %103 {strides = array<i32>} : memref<8x8x32xf32, #tpu.memory_space<vmem>>, vector<1x8x32xf32>,
    %c4 = arith.constant 4 : index
    %c0_36 = arith.constant 0 : index
    %c0_37 = arith.constant 0 : index
    %104 = vector.load %arg2[%c4, %c0_36, %c0_37] : memref<8x8x128xbf16, #tpu.memory_space<vmem>>, vector<1x8x128xbf16>
    %105 = vector.shape_cast %104 : vector<1x8x128xbf16> to vector<8x128xbf16>
    %106 = arith.extf %105 : vector<8x128xbf16> to vector<8x128xf32>
    %107 = arith.truncf %100 : vector<8x32xf32> to vector<8x32xbf16>
    %cst_38 = arith.constant dense<0.000000e+00> : vector<8x128xf32>
    %108 = tpu.matmul %107, %3, %cst_38 {dimension_numbers = #tpu.dot_dimension_numbers<[1], [0], [0], [1], [0, 0, 1, 1], [], []>} : vector<8x32xbf16>, vector<32x128xbf16>, vector<8x128xf32> -> vector<8x128xf32>
    %109 = arith.addf %106, %108 : vector<8x128xf32>
    %110 = arith.negf %109 : vector<8x128xf32>
    %111 = math.exp %110 : vector<8x128xf32>
    %cst_39 = arith.constant 1.000000e+00 : f32
    %112 = vector.broadcast %cst_39 : f32 to vector<8x128xf32>
    %113 = arith.addf %112, %111 : vector<8x128xf32>
    %114 = arith.divf %112, %113 : vector<8x128xf32>
    %115 = math.tanh %109 : vector<8x128xf32>
    %116 = vector.extract_strided_slice %114 {offsets = [0, 0], sizes = [8, 32], strides = [1, 1]} : vector<8x128xf32> to vector<8x32xf32>
    %117 = vector.extract_strided_slice %114 {offsets = [0, 32], sizes = [8, 32], strides = [1, 1]} : vector<8x128xf32> to vector<8x32xf32>
    %118 = vector.extract_strided_slice %115 {offsets = [0, 64], sizes = [8, 32], strides = [1, 1]} : vector<8x128xf32> to vector<8x32xf32>
    %119 = vector.extract_strided_slice %114 {offsets = [0, 96], sizes = [8, 32], strides = [1, 1]} : vector<8x128xf32> to vector<8x32xf32>
    %120 = arith.mulf %117, %98 : vector<8x32xf32>
    %121 = arith.mulf %116, %118 : vector<8x32xf32>
    %122 = arith.addf %120, %121 : vector<8x32xf32>
    %123 = math.tanh %122 : vector<8x32xf32>
    %124 = arith.mulf %119, %123 : vector<8x32xf32>
    %c4_40 = arith.constant 4 : index
    %c0_41 = arith.constant 0 : index
    %c0_42 = arith.constant 0 : index
    %125 = vector.load %arg4[%c4_40, %c0_41, %c0_42] : memref<8x8x32xf32, #tpu.memory_space<vmem>>, vector<1x8x32xf32>
    %126 = vector.shape_cast %125 : vector<1x8x32xf32> to vector<8x32xf32>
    %127 = vector.shape_cast %124 : vector<8x32xf32> to vector<1x8x32xf32>
    tpu.vector_store %arg4[%c4_40, %c0_41, %c0_42], %127 {strides = array<i32>} : memref<8x8x32xf32, #tpu.memory_space<vmem>>, vector<1x8x32xf32>,
    %c5 = arith.constant 5 : index
    %c0_43 = arith.constant 0 : index
    %c0_44 = arith.constant 0 : index
    %128 = vector.load %arg2[%c5, %c0_43, %c0_44] : memref<8x8x128xbf16, #tpu.memory_space<vmem>>, vector<1x8x128xbf16>
    %129 = vector.shape_cast %128 : vector<1x8x128xbf16> to vector<8x128xbf16>
    %130 = arith.extf %129 : vector<8x128xbf16> to vector<8x128xf32>
    %131 = arith.truncf %124 : vector<8x32xf32> to vector<8x32xbf16>
    %cst_45 = arith.constant dense<0.000000e+00> : vector<8x128xf32>
    %132 = tpu.matmul %131, %3, %cst_45 {dimension_numbers = #tpu.dot_dimension_numbers<[1], [0], [0], [1], [0, 0, 1, 1], [], []>} : vector<8x32xbf16>, vector<32x128xbf16>, vector<8x128xf32> -> vector<8x128xf32>
    %133 = arith.addf %130, %132 : vector<8x128xf32>
    %134 = arith.negf %133 : vector<8x128xf32>
    %135 = math.exp %134 : vector<8x128xf32>
    %cst_46 = arith.constant 1.000000e+00 : f32
    %136 = vector.broadcast %cst_46 : f32 to vector<8x128xf32>
    %137 = arith.addf %136, %135 : vector<8x128xf32>
    %138 = arith.divf %136, %137 : vector<8x128xf32>
    %139 = math.tanh %133 : vector<8x128xf32>
    %140 = vector.extract_strided_slice %138 {offsets = [0, 0], sizes = [8, 32], strides = [1, 1]} : vector<8x128xf32> to vector<8x32xf32>
    %141 = vector.extract_strided_slice %138 {offsets = [0, 32], sizes = [8, 32], strides = [1, 1]} : vector<8x128xf32> to vector<8x32xf32>
    %142 = vector.extract_strided_slice %139 {offsets = [0, 64], sizes = [8, 32], strides = [1, 1]} : vector<8x128xf32> to vector<8x32xf32>
    %143 = vector.extract_strided_slice %138 {offsets = [0, 96], sizes = [8, 32], strides = [1, 1]} : vector<8x128xf32> to vector<8x32xf32>
    %144 = arith.mulf %141, %122 : vector<8x32xf32>
    %145 = arith.mulf %140, %142 : vector<8x32xf32>
    %146 = arith.addf %144, %145 : vector<8x32xf32>
    %147 = math.tanh %146 : vector<8x32xf32>
    %148 = arith.mulf %143, %147 : vector<8x32xf32>
    %c5_47 = arith.constant 5 : index
    %c0_48 = arith.constant 0 : index
    %c0_49 = arith.constant 0 : index
    %149 = vector.load %arg4[%c5_47, %c0_48, %c0_49] : memref<8x8x32xf32, #tpu.memory_space<vmem>>, vector<1x8x32xf32>
    %150 = vector.shape_cast %149 : vector<1x8x32xf32> to vector<8x32xf32>
    %151 = vector.shape_cast %148 : vector<8x32xf32> to vector<1x8x32xf32>
    tpu.vector_store %arg4[%c5_47, %c0_48, %c0_49], %151 {strides = array<i32>} : memref<8x8x32xf32, #tpu.memory_space<vmem>>, vector<1x8x32xf32>,
    %c6 = arith.constant 6 : index
    %c0_50 = arith.constant 0 : index
    %c0_51 = arith.constant 0 : index
    %152 = vector.load %arg2[%c6, %c0_50, %c0_51] : memref<8x8x128xbf16, #tpu.memory_space<vmem>>, vector<1x8x128xbf16>
    %153 = vector.shape_cast %152 : vector<1x8x128xbf16> to vector<8x128xbf16>
    %154 = arith.extf %153 : vector<8x128xbf16> to vector<8x128xf32>
    %155 = arith.truncf %148 : vector<8x32xf32> to vector<8x32xbf16>
    %cst_52 = arith.constant dense<0.000000e+00> : vector<8x128xf32>
    %156 = tpu.matmul %155, %3, %cst_52 {dimension_numbers = #tpu.dot_dimension_numbers<[1], [0], [0], [1], [0, 0, 1, 1], [], []>} : vector<8x32xbf16>, vector<32x128xbf16>, vector<8x128xf32> -> vector<8x128xf32>
    %157 = arith.addf %154, %156 : vector<8x128xf32>
    %158 = arith.negf %157 : vector<8x128xf32>
    %159 = math.exp %158 : vector<8x128xf32>
    %cst_53 = arith.constant 1.000000e+00 : f32
    %160 = vector.broadcast %cst_53 : f32 to vector<8x128xf32>
    %161 = arith.addf %160, %159 : vector<8x128xf32>
    %162 = arith.divf %160, %161 : vector<8x128xf32>
    %163 = math.tanh %157 : vector<8x128xf32>
    %164 = vector.extract_strided_slice %162 {offsets = [0, 0], sizes = [8, 32], strides = [1, 1]} : vector<8x128xf32> to vector<8x32xf32>
    %165 = vector.extract_strided_slice %162 {offsets = [0, 32], sizes = [8, 32], strides = [1, 1]} : vector<8x128xf32> to vector<8x32xf32>
    %166 = vector.extract_strided_slice %163 {offsets = [0, 64], sizes = [8, 32], strides = [1, 1]} : vector<8x128xf32> to vector<8x32xf32>
    %167 = vector.extract_strided_slice %162 {offsets = [0, 96], sizes = [8, 32], strides = [1, 1]} : vector<8x128xf32> to vector<8x32xf32>
    %168 = arith.mulf %165, %146 : vector<8x32xf32>
    %169 = arith.mulf %164, %166 : vector<8x32xf32>
    %170 = arith.addf %168, %169 : vector<8x32xf32>
    %171 = math.tanh %170 : vector<8x32xf32>
    %172 = arith.mulf %167, %171 : vector<8x32xf32>
    %c6_54 = arith.constant 6 : index
    %c0_55 = arith.constant 0 : index
    %c0_56 = arith.constant 0 : index
    %173 = vector.load %arg4[%c6_54, %c0_55, %c0_56] : memref<8x8x32xf32, #tpu.memory_space<vmem>>, vector<1x8x32xf32>
    %174 = vector.shape_cast %173 : vector<1x8x32xf32> to vector<8x32xf32>
    %175 = vector.shape_cast %172 : vector<8x32xf32> to vector<1x8x32xf32>
    tpu.vector_store %arg4[%c6_54, %c0_55, %c0_56], %175 {strides = array<i32>} : memref<8x8x32xf32, #tpu.memory_space<vmem>>, vector<1x8x32xf32>,
    %c7 = arith.constant 7 : index
    %c0_57 = arith.constant 0 : index
    %c0_58 = arith.constant 0 : index
    %176 = vector.load %arg2[%c7, %c0_57, %c0_58] : memref<8x8x128xbf16, #tpu.memory_space<vmem>>, vector<1x8x128xbf16>
    %177 = vector.shape_cast %176 : vector<1x8x128xbf16> to vector<8x128xbf16>
    %178 = arith.extf %177 : vector<8x128xbf16> to vector<8x128xf32>
    %179 = arith.truncf %172 : vector<8x32xf32> to vector<8x32xbf16>
    %cst_59 = arith.constant dense<0.000000e+00> : vector<8x128xf32>
    %180 = tpu.matmul %179, %3, %cst_59 {dimension_numbers = #tpu.dot_dimension_numbers<[1], [0], [0], [1], [0, 0, 1, 1], [], []>} : vector<8x32xbf16>, vector<32x128xbf16>, vector<8x128xf32> -> vector<8x128xf32>
    %181 = arith.addf %178, %180 : vector<8x128xf32>
    %182 = arith.negf %181 : vector<8x128xf32>
    %183 = math.exp %182 : vector<8x128xf32>
    %cst_60 = arith.constant 1.000000e+00 : f32
    %184 = vector.broadcast %cst_60 : f32 to vector<8x128xf32>
    %185 = arith.addf %184, %183 : vector<8x128xf32>
    %186 = arith.divf %184, %185 : vector<8x128xf32>
    %187 = math.tanh %181 : vector<8x128xf32>
    %188 = vector.extract_strided_slice %186 {offsets = [0, 0], sizes = [8, 32], strides = [1, 1]} : vector<8x128xf32> to vector<8x32xf32>
    %189 = vector.extract_strided_slice %186 {offsets = [0, 32], sizes = [8, 32], strides = [1, 1]} : vector<8x128xf32> to vector<8x32xf32>
    %190 = vector.extract_strided_slice %187 {offsets = [0, 64], sizes = [8, 32], strides = [1, 1]} : vector<8x128xf32> to vector<8x32xf32>
    %191 = vector.extract_strided_slice %186 {offsets = [0, 96], sizes = [8, 32], strides = [1, 1]} : vector<8x128xf32> to vector<8x32xf32>
    %192 = arith.mulf %189, %170 : vector<8x32xf32>
    %193 = arith.mulf %188, %190 : vector<8x32xf32>
    %194 = arith.addf %192, %193 : vector<8x32xf32>
    %195 = math.tanh %194 : vector<8x32xf32>
    %196 = arith.mulf %191, %195 : vector<8x32xf32>
    %c7_61 = arith.constant 7 : index
    %c0_62 = arith.constant 0 : index
    %c0_63 = arith.constant 0 : index
    %197 = vector.load %arg4[%c7_61, %c0_62, %c0_63] : memref<8x8x32xf32, #tpu.memory_space<vmem>>, vector<1x8x32xf32>
    %198 = vector.shape_cast %197 : vector<1x8x32xf32> to vector<8x32xf32>
    %199 = vector.shape_cast %196 : vector<8x32xf32> to vector<1x8x32xf32>
    tpu.vector_store %arg4[%c7_61, %c0_62, %c0_63], %199 {strides = array<i32>} : memref<8x8x32xf32, #tpu.memory_space<vmem>>, vector<1x8x32xf32>,
    %c0_i32_64 = arith.constant 0 : i32
    %200 = arith.cmpi eq, %arg1, %c0_i32_64 : i32
    %201 = arith.extui %200 : i1 to i32
    %c0_i32_65 = arith.constant 0 : i32
    %202 = arith.cmpi ne, %201, %c0_i32_65 : i32
    scf.if %202 {
      %c0_68 = arith.constant 0 : index
      %c0_69 = arith.constant 0 : index
      %c0_70 = arith.constant 0 : index
      %206 = vector.load %arg5[%c0_68, %c0_69, %c0_70] : memref<1x8x32xf32, #tpu.memory_space<vmem>>, vector<1x8x32xf32>
      %207 = vector.shape_cast %206 : vector<1x8x32xf32> to vector<8x32xf32>
      %208 = vector.shape_cast %196 : vector<8x32xf32> to vector<1x8x32xf32>
      tpu.vector_store %arg5[%c0_68, %c0_69, %c0_70], %208 {strides = array<i32>} : memref<1x8x32xf32, #tpu.memory_space<vmem>>, vector<1x8x32xf32>,
      %c0_71 = arith.constant 0 : index
      %c0_72 = arith.constant 0 : index
      %c0_73 = arith.constant 0 : index
      %209 = vector.load %arg6[%c0_71, %c0_72, %c0_73] : memref<1x8x32xf32, #tpu.memory_space<vmem>>, vector<1x8x32xf32>
      %210 = vector.shape_cast %209 : vector<1x8x32xf32> to vector<8x32xf32>
      %211 = vector.shape_cast %194 : vector<8x32xf32> to vector<1x8x32xf32>
      tpu.vector_store %arg6[%c0_71, %c0_72, %c0_73], %211 {strides = array<i32>} : memref<1x8x32xf32, #tpu.memory_space<vmem>>, vector<1x8x32xf32>,
    } else {
    }
    %c0_i32_66 = arith.constant 0 : i32
    %203 = arith.cmpi slt, %arg1, %c0_i32_66 : i32
    %204 = arith.extui %203 : i1 to i32
    %c0_i32_67 = arith.constant 0 : i32
    %205 = arith.cmpi ne, %204, %c0_i32_67 : i32
    scf.if %205 {
      %c0_68 = arith.constant 0 : index
      %c0_69 = arith.constant 0 : index
      %c0_70 = arith.constant 0 : index
      %206 = vector.load %arg7[%c0_68, %c0_69, %c0_70] : memref<1x8x32xf32, #tpu.memory_space<vmem>>, vector<1x8x32xf32>
      %207 = vector.shape_cast %206 : vector<1x8x32xf32> to vector<8x32xf32>
      %208 = vector.shape_cast %196 : vector<8x32xf32> to vector<1x8x32xf32>
      tpu.vector_store %arg7[%c0_68, %c0_69, %c0_70], %208 {strides = array<i32>} : memref<1x8x32xf32, #tpu.memory_space<vmem>>, vector<1x8x32xf32>,
      %c0_71 = arith.constant 0 : index
      %c0_72 = arith.constant 0 : index
      %c0_73 = arith.constant 0 : index
      %209 = vector.load %arg8[%c0_71, %c0_72, %c0_73] : memref<1x8x32xf32, #tpu.memory_space<vmem>>, vector<1x8x32xf32>
      %210 = vector.shape_cast %209 : vector<1x8x32xf32> to vector<8x32xf32>
      %211 = vector.shape_cast %194 : vector<8x32xf32> to vector<1x8x32xf32>
      tpu.vector_store %arg8[%c0_71, %c0_72, %c0_73], %211 {strides = array<i32>} : memref<1x8x32xf32, #tpu.memory_space<vmem>>, vector<1x8x32xf32>,
    } else {
    }
    return
  }
  func.func @transform_0(%arg0: i32, %arg1: i32) -> (i32, i32, i32) {
    %c0_i32 = arith.constant 0 : i32
    %c0_i32_0 = arith.constant 0 : i32
    return %arg1, %arg0, %c0_i32 : i32, i32, i32
  }
  func.func @transform_1(%arg0: i32, %arg1: i32) -> (i32, i32) {
    %c0_i32 = arith.constant 0 : i32
    %c0_i32_0 = arith.constant 0 : i32
    %c0_i32_1 = arith.constant 0 : i32
    return %c0_i32, %c0_i32_0 : i32, i32
  }
  func.func @transform_2(%arg0: i32, %arg1: i32) -> (i32, i32, i32) {
    %c0_i32 = arith.constant 0 : i32
    %c0_i32_0 = arith.constant 0 : i32
    return %arg1, %arg0, %c0_i32 : i32, i32, i32
  }
  func.func @transform_3(%arg0: i32, %arg1: i32) -> (i32, i32, i32) {
    %c0_i32 = arith.constant 0 : i32
    %c0_i32_0 = arith.constant 0 : i32
    %c0_i32_1 = arith.constant 0 : i32
    return %c0_i32, %arg0, %c0_i32_0 : i32, i32, i32
  }
  func.func @transform_4(%arg0: i32, %arg1: i32) -> (i32, i32, i32) {
    %c0_i32 = arith.constant 0 : i32
    %c0_i32_0 = arith.constant 0 : i32
    %c0_i32_1 = arith.constant 0 : i32
    return %c0_i32, %arg0, %c0_i32_0 : i32, i32, i32
  }
}

</mosaic_0001>

<bundles_post_ra>
// kernel: tpu_custom_call.1
= control target key start
LH: loop header
LB: loop body
LE: loop exit
PB: predicated region body
PF: predicated region fallthrough
CT: control target
= control target key end

     0   :  { %10 = vsyncpa [#allocation5], 0  ;;  %s1056_s0 = inlined_call_operand.hbm [shape: bf16[8,8,128], index: 0, kind: input, shape index: {}]   ;;  %s1057_s1 = inlined_call_operand.hbm [shape: bf16[32,128], index: 1, kind: input, shape index: {}]   ;;  %s1058_s2 = inlined_call_operand.hbm [shape: f32[8,8,32], index: 2, kind: output, shape index: {0}]   ;;  %s1059_s3 = inlined_call_operand.hbm [shape: f32[1,8,32], index: 3, kind: output, shape index: {1}]   ;;  %s1060_s4 = inlined_call_operand.hbm [shape: f32[1,8,32], index: 4, kind: output, shape index: {2}]  }
   0x1   :  { %11 = vsyncpa [#allocation8], 0 }
   0x2   :  { %12 = vsyncpa [#allocation6], 0 }
   0x3   :  { %13 = vsyncpa [#allocation11], 0  ;;  %s18_s17 = sshll.u32 %s1056_s0, 4  ;;  %s910_s18 = smov [#allocation4]   ;;  %s19_s17 = int_to_ptr.hbm [resolvable:$true] %s18_s17 }
   0x4   :  { %s20_s19 = sshll.u32 %s910_s18, 4  ;;  %s31_s22 = sshll.u32 %s1057_s1, 4  ;;  %s21_s19 = int_to_ptr.vmem [resolvable:$true] %s20_s19  ;;  %s32_s22 = int_to_ptr.hbm [resolvable:$true] %s31_s22 }
   0x5   :  { %s911_s23 = smov 64   ;;  %s912_s24 = smov 4  }
   0x6   :  { %26 = dma.hbm_to_vmem [thread:$0]  %s19_s17, 512, %s21_s19, [#allocation5], %s911_s23, %s911_s23, %s912_s24  }
   0x7   :  { %s913_s25 = smov [#allocation7]  }
   0x8   :  { %s33_s26 = sshll.u32 %s913_s25, 4  ;;  %s34_s26 = int_to_ptr.vmem [resolvable:$true] %s33_s26 }
   0x9   :  { %39 = dma.hbm_to_vmem [thread:$0]  %s32_s22, 256, %s34_s26, [#allocation8], %s911_s23, %s911_s23, %s912_s24  }
   0xa   :  { %902 = dma.done.wait [#allocation5], 512  }
   0xb   :  { %903 = vsyncadd [#allocation5], 4294966784 }
   0xc   :  { %904 = dma.done.wait [#allocation8], 256  }
   0xd   :  { %905 = vsyncadd [#allocation8], 4294967040  ;;  %vm53_vm0 = vcmask 261120   ;;  %v914_v0 = vmov 0.0   ;;  %v705_v1 = vld [vmem:[#allocation7 + $0x8] sm:$0xff]  ;;  %v704_v2 = vld [vmem:[#allocation7] sm:$0xff] }
   0xe   :  { %54 = vst.msk [vmem:[#allocation2] sm:$0xff] %vm53_vm0, %v914_v0  ;;  %87 = vmatpush.bf16.msra.mxu0 %v705_v1  ;;  %157 = vmatpush.bf16.msra.mxu1 %v705_v1  ;;  %v62_v5 = vld [vmem:[#allocation4] sm:$0xff]   ;;  %s915_s0 = smov 32   ;;  %s916_s1 = smov 96  }
   0xf   :  { %55 = vst.msk [vmem:[#allocation3] sm:$0xff] %vm53_vm0, %v914_v0  ;;  %224 = vmatpush.bf16.msra.mxu2 %v705_v1  ;;  %291 = vmatpush.bf16.msra.mxu3 %v705_v1  ;;  %v63_v6 = vunpack.c.l.bf16 %v62_v5  ;;  %v143_v36 = vunpack.c.h.bf16 %v62_v5  ;;  %v209_v0 = vld [vmem:[#allocation4 + $0x8] sm:$0xff]   ;;  %s917_s27 = smov [#allocation10]   ;;  %s649_s5 = sshll.u32 %s1059_s3, 4  ;;  %s650_s5 = int_to_ptr.hbm [resolvable:$true] %s649_s5 }
  0x10   :  { %s647_s28 = sshll.u32 %s917_s27, 4  ;;  %s918_s6 = smov [#allocation12]   ;;  %s648_s28 = int_to_ptr.vmem [resolvable:$true] %s647_s28 }
  0x11   :  { %s658_s7 = sshll.u32 %s918_s6, 4  ;;  %s660_s10 = sshll.u32 %s1060_s4, 4  ;;  %s659_s7 = int_to_ptr.vmem [resolvable:$true] %s658_s7  ;;  %s661_s10 = int_to_ptr.hbm [resolvable:$true] %s660_s10 }
  0x12   :  { %88 = vmatpush.bf16.msra.mxu0 %v704_v2  ;;  %158 = vmatpush.bf16.msra.mxu1 %v704_v2  ;;  %s919_s11 = smov [#allocation9]   ;;  %s635_s3 = sshll.u32 %s1058_s2, 4  ;;  %s636_s3 = int_to_ptr.hbm [resolvable:$true] %s635_s3 }
  0x13   :  { %225 = vmatpush.bf16.msra.mxu2 %v704_v2  ;;  %292 = vmatpush.bf16.msra.mxu3 %v704_v2  ;;  %s633_s12 = sshll.u32 %s919_s11, 4  ;;  %s920_s4 = smov 128   ;;  %s634_s12 = int_to_ptr.vmem [resolvable:$true] %s633_s12 }
  0x14   :  { %s921_s15 = smov 8  }
  0x15   :  { %v60_v3 = vld [vmem:[#allocation2] sm:$0xff] }
  0x16   :  { %v64_v4 = vpack.c.bf16 %v60_v3, %v60_v3  ;;  %358 = vmatpush.bf16.msrb.mxu0 %v705_v1  ;;  %425 = vmatpush.bf16.msrb.mxu1 %v705_v1  ;;  %v61_v11 = vld [vmem:[#allocation3] sm:$0xff] }
  0x17   :  { %492 = vmatpush.bf16.msrb.mxu2 %v705_v1  ;;  %559 = vmatpush.bf16.msrb.mxu3 %v705_v1  ;;  %v210_v1 = vunpack.c.l.bf16 %v209_v0 }
  0x18   :  { %688 = vmatmul.msk.bf16.vlgmr.msra.gmra.mxu0 %vm53_vm0, %v64_v4 }
  0x1a   :  { %359 = vmatpush.bf16.msrb.mxu0 %v704_v2  ;;  %426 = vmatpush.bf16.msrb.mxu1 %v704_v2 }
  0x1b   :  { %493 = vmatpush.bf16.msrb.mxu2 %v704_v2  ;;  %560 = vmatpush.bf16.msrb.mxu3 %v704_v2 }
  0x95   :  { %v90_v7 = vpop.f32.mrf.mxu0 }
  0x96   :  { %v94_v8 = vadd.f32 %v90_v7, %v63_v6 }
  0x98   :  { %718 = vtanh.f32 %v94_v8  ;;  %v689_v12 = vmul.f32 -1.442695, %v94_v8 }
  0x9a   :  { %720 = vpow2.f32 %v689_v12 }
  0x9d   :  { %v92_v9 = vpop.f32.mrf.mxu0 }
  0x9e   :  { %v719_v10 = vpop.eup %718 }
  0x9f   :  { %121 = vrot.lane.b32.xlu0 %v719_v10, %s911_s23 }
  0xa0   :  { %v721_v13 = vpop.eup %720 }
  0xa1   :  { %v98_v14 = vadd.f32 1.0, %v721_v13 }
  0xa3   :  { %722 = vrcp.f32 %v98_v14  ;;  %v110_v20 = vand.u32 2147483648, %v98_v14  ;;  %vm104_vm2 = vweird.f32 %v98_v14  ;;  %v108_v21 = vand.u32 2147483647, %v98_v14 }
  0xa5   :  { %v111_v23 = vor.u32 1.1754944e-38, %v110_v20  ;;  %vm109_vm4 = vcmp.eq.f32.partialorder %v108_v21, 8.507059e+37 }
  0xa7   :  { %116 = vrot.lane.b32.xlu0 %v61_v11, %s915_s0 }
  0xa9   :  { %v723_v15 = vpop.eup %722 }
  0xaa   :  { %v100_v16 = vmul.f32 %v723_v15, %v98_v14  ;;  %vm105_vm1 = vweird.f32 %v723_v15 }
  0xab   :  { %vm106_vm3 = vmor %vm104_vm2, %vm105_vm1 }
  0xac   :  { %v101_v17 = vsub.f32 1.0, %v100_v16 }
  0xae   :  { %v102_v18 = vmul.f32 %v723_v15, %v101_v17 }
  0xb0   :  { %v103_v19 = vadd.f32 %v723_v15, %v102_v18 }
  0xb2   :  { %v107_v22 = vsel %vm106_vm3, %v723_v15, %v103_v19 }
  0xb3   :  { %v112_v25 = vsel %vm109_vm4, %v111_v23, %v107_v22 }
 0x111   :  { %v122_v24 = vpop.permute.xlu0 %121 }
 0x112   :  { %v124_v26 = vmul.f32 %v122_v24, %v112_v25 }
 0x114   :  { %126 = vrot.lane.b32.xlu1 %v124_v26, %s915_s0 }
 0x119   :  { %v117_v27 = vpop.permute.xlu0 %116 }
 0x11a   :  { %v119_v28 = vmul.f32 %v117_v27, %v112_v25 }
 0x186   :  { %v127_v29 = vpop.permute.xlu1 %126 }
 0x187   :  { %v129_v30 = vadd.f32 %v127_v29, %v119_v28  ;;  %v277_v29 = vunpack.c.h.bf16 %v209_v0 }
 0x189   :  { %724 = vtanh.f32 %v129_v30 }
 0x18f   :  { %v725_v31 = vpop.eup %724 }
 0x190   :  { %132 = vrot.lane.b32.xlu1 %v725_v31, %s911_s23 }
 0x202   :  { %v133_v32 = vpop.permute.xlu1 %132 }
 0x203   :  { %v964_v33 = vmul.f32 %v133_v32, %v112_v25 }
 0x205   :  { %v144_v34 = vpack.c.bf16 %v964_v33, %v964_v33 }
 0x207   :  { %146 = vrot.lane.b32.xlu2 %v144_v34, %s915_s0 }
 0x261   :  { %v147_v35 = vpop.permute.xlu2 %146 }
 0x262   :  { %690 = vmatmul.msk.bf16.vlgmr.msra.gmra.mxu1 %vm53_vm0, %v147_v35 }
 0x2df   :  { %v160_v37 = vpop.f32.mrf.mxu1 }
 0x2e0   :  { %v164_v38 = vadd.f32 %v160_v37, %v143_v36 }
 0x2e2   :  { %726 = vtanh.f32 %v164_v38  ;;  %v691_v41 = vmul.f32 -1.442695, %v164_v38 }
 0x2e4   :  { %728 = vpow2.f32 %v691_v41 }
 0x2e7   :  { %v162_v39 = vpop.f32.mrf.mxu1 }
 0x2e8   :  { %v727_v40 = vpop.eup %726 }
 0x2e9   :  { %187 = vrot.lane.b32.xlu2 %v727_v40, %s911_s23 }
 0x2ea   :  { %v729_v42 = vpop.eup %728 }
 0x2eb   :  { %v168_v43 = vadd.f32 1.0, %v729_v42 }
 0x2ed   :  { %730 = vrcp.f32 %v168_v43  ;;  %v180_v49 = vand.u32 2147483648, %v168_v43  ;;  %vm174_vm6 = vweird.f32 %v168_v43  ;;  %v178_v50 = vand.u32 2147483647, %v168_v43 }
 0x2ef   :  { %v181_v52 = vor.u32 1.1754944e-38, %v180_v49  ;;  %vm179_vm8 = vcmp.eq.f32.partialorder %v178_v50, 8.507059e+37 }
 0x2f3   :  { %v731_v44 = vpop.eup %730 }
 0x2f4   :  { %v170_v45 = vmul.f32 %v731_v44, %v168_v43  ;;  %vm175_vm5 = vweird.f32 %v731_v44 }
 0x2f5   :  { %vm176_vm7 = vmor %vm174_vm6, %vm175_vm5 }
 0x2f6   :  { %v171_v46 = vsub.f32 1.0, %v170_v45 }
 0x2f8   :  { %v172_v47 = vmul.f32 %v731_v44, %v171_v46 }
 0x2fa   :  { %v173_v48 = vadd.f32 %v731_v44, %v172_v47 }
 0x2fc   :  { %v177_v51 = vsel %vm176_vm7, %v731_v44, %v173_v48 }
 0x2fd   :  { %v182_v54 = vsel %vm179_vm8, %v181_v52, %v177_v51 }
 0x2fe   :  { %v185_v56 = vmul.f32 %v182_v54, %v129_v30 }
 0x343   :  { %v188_v53 = vpop.permute.xlu2 %187 }
 0x344   :  { %v190_v55 = vmul.f32 %v188_v53, %v182_v54 }
 0x346   :  { %192 = vrot.lane.b32.xlu0 %v190_v55, %s915_s0 }
 0x3b8   :  { %v193_v57 = vpop.permute.xlu0 %192 }
 0x3b9   :  { %v195_v58 = vadd.f32 %v193_v57, %v185_v56 }
 0x3bb   :  { %732 = vtanh.f32 %v195_v58 }
 0x3c1   :  { %v733_v59 = vpop.eup %732 }
 0x3c2   :  { %198 = vrot.lane.b32.xlu1 %v733_v59, %s911_s23 }
 0x434   :  { %v199_v60 = vpop.permute.xlu1 %198 }
 0x435   :  { %v973_v61 = vmul.f32 %v199_v60, %v182_v54 }
 0x437   :  { %v211_v62 = vpack.c.bf16 %v973_v61, %v973_v61 }
 0x439   :  { %213 = vrot.lane.b32.xlu2 %v211_v62, %s915_s0 }
 0x493   :  { %v214_v63 = vpop.permute.xlu2 %213 }
 0x494   :  { %692 = vmatmul.msk.bf16.vlgmr.msra.gmra.mxu2 %vm53_vm0, %v214_v63 }
 0x517   :  { %v227_v2 = vpop.f32.mrf.mxu2 }
 0x518   :  { %v231_v3 = vadd.f32 %v227_v2, %v210_v1 }
 0x51a   :  { %734 = vtanh.f32 %v231_v3  ;;  %v693_v6 = vmul.f32 -1.442695, %v231_v3 }
 0x51c   :  { %736 = vpow2.f32 %v693_v6 }
 0x51f   :  { %v229_v4 = vpop.f32.mrf.mxu2 }
 0x520   :  { %v735_v5 = vpop.eup %734 }
 0x521   :  { %254 = vrot.lane.b32.xlu0 %v735_v5, %s911_s23 }
 0x522   :  { %v737_v7 = vpop.eup %736 }
 0x523   :  { %v235_v8 = vadd.f32 1.0, %v737_v7 }
 0x525   :  { %738 = vrcp.f32 %v235_v8  ;;  %v247_v14 = vand.u32 2147483648, %v235_v8  ;;  %vm241_vm10 = vweird.f32 %v235_v8  ;;  %v245_v15 = vand.u32 2147483647, %v235_v8 }
 0x527   :  { %v248_v17 = vor.u32 1.1754944e-38, %v247_v14  ;;  %vm246_vm12 = vcmp.eq.f32.partialorder %v245_v15, 8.507059e+37 }
 0x52b   :  { %v739_v9 = vpop.eup %738 }
 0x52c   :  { %v237_v10 = vmul.f32 %v739_v9, %v235_v8  ;;  %vm242_vm9 = vweird.f32 %v739_v9 }
 0x52d   :  { %vm243_vm11 = vmor %vm241_vm10, %vm242_vm9 }
 0x52e   :  { %v238_v11 = vsub.f32 1.0, %v237_v10 }
 0x530   :  { %v239_v12 = vmul.f32 %v739_v9, %v238_v11 }
 0x532   :  { %v240_v13 = vadd.f32 %v739_v9, %v239_v12 }
 0x534   :  { %v244_v16 = vsel %vm243_vm11, %v739_v9, %v240_v13 }
 0x535   :  { %v249_v19 = vsel %vm246_vm12, %v248_v17, %v244_v16 }
 0x536   :  { %v252_v21 = vmul.f32 %v249_v19, %v195_v58  ;;  %v343_v58 = vld [vmem:[#allocation4 + $0x10] sm:$0xff]  }
 0x537   :  { %v344_v59 = vunpack.c.l.bf16 %v343_v58 }
 0x593   :  { %v255_v18 = vpop.permute.xlu0 %254 }
 0x594   :  { %v257_v20 = vmul.f32 %v255_v18, %v249_v19 }
 0x596   :  { %259 = vrot.lane.b32.xlu1 %v257_v20, %s915_s0 }
 0x608   :  { %v260_v22 = vpop.permute.xlu1 %259 }
 0x609   :  { %v262_v23 = vadd.f32 %v260_v22, %v252_v21 }
 0x60b   :  { %740 = vtanh.f32 %v262_v23 }
 0x611   :  { %v741_v24 = vpop.eup %740 }
 0x612   :  { %265 = vrot.lane.b32.xlu2 %v741_v24, %s911_s23  ;;  %v411_v24 = vunpack.c.h.bf16 %v343_v58 }
 0x66c   :  { %v266_v25 = vpop.permute.xlu2 %265 }
 0x66d   :  { %v982_v26 = vmul.f32 %v266_v25, %v249_v19 }
 0x66f   :  { %v278_v27 = vpack.c.bf16 %v982_v26, %v982_v26 }
 0x671   :  { %280 = vrot.lane.b32.xlu0 %v278_v27, %s915_s0 }
 0x6e3   :  { %v281_v28 = vpop.permute.xlu0 %280 }
 0x6e4   :  { %694 = vmatmul.msk.bf16.vlgmr.msra.gmra.mxu3 %vm53_vm0, %v281_v28 }
 0x767   :  { %v294_v30 = vpop.f32.mrf.mxu3 }
 0x768   :  { %v298_v31 = vadd.f32 %v294_v30, %v277_v29 }
 0x76a   :  { %742 = vtanh.f32 %v298_v31  ;;  %v695_v35 = vmul.f32 -1.442695, %v298_v31 }
 0x76c   :  { %744 = vpow2.f32 %v695_v35 }
 0x76f   :  { %v296_v32 = vpop.f32.mrf.mxu3 }
 0x770   :  { %v743_v34 = vpop.eup %742 }
 0x771   :  { %321 = vrot.lane.b32.xlu1 %v743_v34, %s911_s23 }
 0x772   :  { %v745_v36 = vpop.eup %744 }
 0x773   :  { %v302_v37 = vadd.f32 1.0, %v745_v36 }
 0x775   :  { %746 = vrcp.f32 %v302_v37  ;;  %v314_v43 = vand.u32 2147483648, %v302_v37  ;;  %vm308_vm14 = vweird.f32 %v302_v37  ;;  %v312_v44 = vand.u32 2147483647, %v302_v37 }
 0x777   :  { %v315_v46 = vor.u32 1.1754944e-38, %v314_v43  ;;  %vm313_vm1 = vcmp.eq.f32.partialorder %v312_v44, 8.507059e+37 }
 0x77b   :  { %v747_v38 = vpop.eup %746 }
 0x77c   :  { %v304_v39 = vmul.f32 %v747_v38, %v302_v37  ;;  %vm309_vm13 = vweird.f32 %v747_v38 }
 0x77d   :  { %vm310_vm15 = vmor %vm308_vm14, %vm309_vm13 }
 0x77e   :  { %v305_v40 = vsub.f32 1.0, %v304_v39 }
 0x780   :  { %v306_v41 = vmul.f32 %v747_v38, %v305_v40 }
 0x782   :  { %v307_v42 = vadd.f32 %v747_v38, %v306_v41 }
 0x784   :  { %v311_v45 = vsel %vm310_vm15, %v747_v38, %v307_v42 }
 0x785   :  { %v316_v48 = vsel %vm313_vm1, %v315_v46, %v311_v45 }
 0x786   :  { %v319_v50 = vmul.f32 %v316_v48, %v262_v23 }
 0x7e3   :  { %v322_v47 = vpop.permute.xlu1 %321 }
 0x7e4   :  { %v324_v49 = vmul.f32 %v322_v47, %v316_v48 }
 0x7e6   :  { %326 = vrot.lane.b32.xlu2 %v324_v49, %s915_s0 }
 0x840   :  { %v327_v51 = vpop.permute.xlu2 %326 }
 0x841   :  { %v329_v52 = vadd.f32 %v327_v51, %v319_v50 }
 0x843   :  { %748 = vtanh.f32 %v329_v52 }
 0x849   :  { %v749_v53 = vpop.eup %748 }
 0x84a   :  { %332 = vrot.lane.b32.xlu0 %v749_v53, %s911_s23 }
 0x8bc   :  { %v333_v54 = vpop.permute.xlu0 %332 }
 0x8bd   :  { %v991_v55 = vmul.f32 %v333_v54, %v316_v48  ;;  %v477_v54 = vld [vmem:[#allocation4 + $0x18] sm:$0xff]  }
 0x8bf   :  { %v345_v56 = vpack.c.bf16 %v991_v55, %v991_v55 }
 0x8c1   :  { %347 = vrot.lane.b32.xlu1 %v345_v56, %s915_s0  ;;  %v478_v56 = vunpack.c.l.bf16 %v477_v54 }
 0x933   :  { %v348_v57 = vpop.permute.xlu1 %347 }
 0x934   :  { %696 = vmatmul.msk.bf16.vlgmr.msrb.gmra.mxu0 %vm53_vm0, %v348_v57 }
 0x9b1   :  { %v361_v60 = vpop.f32.mrf.mxu0 }
 0x9b2   :  { %v365_v62 = vadd.f32 %v361_v60, %v344_v59 }
 0x9b4   :  { %750 = vtanh.f32 %v365_v62  ;;  %v697_v1 = vmul.f32 -1.442695, %v365_v62 }
 0x9b6   :  { %752 = vpow2.f32 %v697_v1 }
 0x9b9   :  { %v363_v63 = vpop.f32.mrf.mxu0 }
 0x9ba   :  { %v751_v0 = vpop.eup %750 }
 0x9bb   :  { %388 = vrot.lane.b32.xlu2 %v751_v0, %s911_s23 }
 0x9bc   :  { %v753_v2 = vpop.eup %752 }
 0x9bd   :  { %v369_v3 = vadd.f32 1.0, %v753_v2 }
 0x9bf   :  { %754 = vrcp.f32 %v369_v3  ;;  %v381_v9 = vand.u32 2147483648, %v369_v3  ;;  %vm375_vm3 = vweird.f32 %v369_v3  ;;  %v379_v10 = vand.u32 2147483647, %v369_v3 }
 0x9c1   :  { %v382_v12 = vor.u32 1.1754944e-38, %v381_v9  ;;  %vm380_vm5 = vcmp.eq.f32.partialorder %v379_v10, 8.507059e+37 }
 0x9c5   :  { %v755_v4 = vpop.eup %754 }
 0x9c6   :  { %v371_v5 = vmul.f32 %v755_v4, %v369_v3  ;;  %vm376_vm2 = vweird.f32 %v755_v4 }
 0x9c7   :  { %vm377_vm4 = vmor %vm375_vm3, %vm376_vm2 }
 0x9c8   :  { %v372_v6 = vsub.f32 1.0, %v371_v5 }
 0x9ca   :  { %v373_v7 = vmul.f32 %v755_v4, %v372_v6 }
 0x9cc   :  { %v374_v8 = vadd.f32 %v755_v4, %v373_v7 }
 0x9ce   :  { %v378_v11 = vsel %vm377_vm4, %v755_v4, %v374_v8 }
 0x9cf   :  { %v383_v14 = vsel %vm380_vm5, %v382_v12, %v378_v11 }
 0x9d0   :  { %v386_v16 = vmul.f32 %v383_v14, %v329_v52 }
 0xa15   :  { %v389_v13 = vpop.permute.xlu2 %388 }
 0xa16   :  { %v391_v15 = vmul.f32 %v389_v13, %v383_v14 }
 0xa18   :  { %393 = vrot.lane.b32.xlu0 %v391_v15, %s915_s0 }
 0xa8a   :  { %v394_v17 = vpop.permute.xlu0 %393 }
 0xa8b   :  { %v396_v18 = vadd.f32 %v394_v17, %v386_v16 }
 0xa8d   :  { %756 = vtanh.f32 %v396_v18 }
 0xa93   :  { %v757_v19 = vpop.eup %756 }
 0xa94   :  { %399 = vrot.lane.b32.xlu1 %v757_v19, %s911_s23 }
 0xb06   :  { %v400_v20 = vpop.permute.xlu1 %399 }
 0xb07   :  { %v1000_v21 = vmul.f32 %v400_v20, %v383_v14 }
 0xb09   :  { %v412_v22 = vpack.c.bf16 %v1000_v21, %v1000_v21 }
 0xb0b   :  { %414 = vrot.lane.b32.xlu2 %v412_v22, %s915_s0  ;;  %v545_v22 = vunpack.c.h.bf16 %v477_v54 }
 0xb65   :  { %v415_v23 = vpop.permute.xlu2 %414 }
 0xb66   :  { %698 = vmatmul.msk.bf16.vlgmr.msrb.gmra.mxu1 %vm53_vm0, %v415_v23 }
 0xbe3   :  { %v428_v25 = vpop.f32.mrf.mxu1 }
 0xbe4   :  { %v432_v27 = vadd.f32 %v428_v25, %v411_v24 }
 0xbe6   :  { %758 = vtanh.f32 %v432_v27  ;;  %v699_v30 = vmul.f32 -1.442695, %v432_v27 }
 0xbe8   :  { %760 = vpow2.f32 %v699_v30 }
 0xbeb   :  { %v430_v28 = vpop.f32.mrf.mxu1 }
 0xbec   :  { %v759_v29 = vpop.eup %758 }
 0xbed   :  { %455 = vrot.lane.b32.xlu0 %v759_v29, %s911_s23 }
 0xbee   :  { %v761_v31 = vpop.eup %760 }
 0xbef   :  { %v436_v32 = vadd.f32 1.0, %v761_v31 }
 0xbf1   :  { %762 = vrcp.f32 %v436_v32  ;;  %v448_v39 = vand.u32 2147483648, %v436_v32  ;;  %vm442_vm7 = vweird.f32 %v436_v32  ;;  %v446_v40 = vand.u32 2147483647, %v436_v32 }
 0xbf3   :  { %v449_v42 = vor.u32 1.1754944e-38, %v448_v39  ;;  %vm447_vm9 = vcmp.eq.f32.partialorder %v446_v40, 8.507059e+37 }
 0xbf7   :  { %v763_v34 = vpop.eup %762 }
 0xbf8   :  { %v438_v35 = vmul.f32 %v763_v34, %v436_v32  ;;  %vm443_vm6 = vweird.f32 %v763_v34 }
 0xbf9   :  { %vm444_vm8 = vmor %vm442_vm7, %vm443_vm6 }
 0xbfa   :  { %v439_v36 = vsub.f32 1.0, %v438_v35 }
 0xbfc   :  { %v440_v37 = vmul.f32 %v763_v34, %v439_v36 }
 0xbfe   :  { %v441_v38 = vadd.f32 %v763_v34, %v440_v37 }
 0xc00   :  { %v445_v41 = vsel %vm444_vm8, %v763_v34, %v441_v38 }
 0xc01   :  { %v450_v44 = vsel %vm447_vm9, %v449_v42, %v445_v41 }
 0xc02   :  { %v453_v46 = vmul.f32 %v450_v44, %v396_v18 }
 0xc5f   :  { %v456_v43 = vpop.permute.xlu0 %455 }
 0xc60   :  { %v458_v45 = vmul.f32 %v456_v43, %v450_v44 }
 0xc62   :  { %460 = vrot.lane.b32.xlu1 %v458_v45, %s915_s0 }
 0xcd4   :  { %v461_v47 = vpop.permute.xlu1 %460 }
 0xcd5   :  { %v463_v48 = vadd.f32 %v461_v47, %v453_v46 }
 0xcd7   :  { %764 = vtanh.f32 %v463_v48 }
 0xcdd   :  { %v765_v49 = vpop.eup %764 }
 0xcde   :  { %466 = vrot.lane.b32.xlu2 %v765_v49, %s911_s23 }
 0xd38   :  { %v467_v50 = vpop.permute.xlu2 %466 }
 0xd39   :  { %v1009_v51 = vmul.f32 %v467_v50, %v450_v44 }
 0xd3b   :  { %v479_v52 = vpack.c.bf16 %v1009_v51, %v1009_v51 }
 0xd3d   :  { %481 = vrot.lane.b32.xlu0 %v479_v52, %s915_s0 }
 0xdaf   :  { %v482_v53 = vpop.permute.xlu0 %481 }
 0xdb0   :  { %700 = vmatmul.msk.bf16.vlgmr.msrb.gmra.mxu2 %vm53_vm0, %v482_v53 }
 0xe33   :  { %v495_v57 = vpop.f32.mrf.mxu2 }
 0xe34   :  { %v499_v58 = vadd.f32 %v495_v57, %v478_v56 }
 0xe36   :  { %766 = vtanh.f32 %v499_v58  ;;  %v701_v62 = vmul.f32 -1.442695, %v499_v58 }
 0xe38   :  { %768 = vpow2.f32 %v701_v62 }
 0xe3b   :  { %v497_v59 = vpop.f32.mrf.mxu2 }
 0xe3c   :  { %v767_v60 = vpop.eup %766 }
 0xe3d   :  { %522 = vrot.lane.b32.xlu1 %v767_v60, %s911_s23 }
 0xe3e   :  { %v769_v63 = vpop.eup %768 }
 0xe3f   :  { %v503_v0 = vadd.f32 1.0, %v769_v63 }
 0xe41   :  { %770 = vrcp.f32 %v503_v0  ;;  %v515_v6 = vand.u32 2147483648, %v503_v0  ;;  %vm509_vm11 = vweird.f32 %v503_v0  ;;  %v513_v7 = vand.u32 2147483647, %v503_v0 }
 0xe43   :  { %v516_v9 = vor.u32 1.1754944e-38, %v515_v6  ;;  %vm514_vm13 = vcmp.eq.f32.partialorder %v513_v7, 8.507059e+37 }
 0xe47   :  { %v771_v1 = vpop.eup %770 }
 0xe48   :  { %v505_v2 = vmul.f32 %v771_v1, %v503_v0  ;;  %vm510_vm10 = vweird.f32 %v771_v1 }
 0xe49   :  { %vm511_vm12 = vmor %vm509_vm11, %vm510_vm10 }
 0xe4a   :  { %v506_v3 = vsub.f32 1.0, %v505_v2 }
 0xe4c   :  { %v507_v4 = vmul.f32 %v771_v1, %v506_v3 }
 0xe4e   :  { %v508_v5 = vadd.f32 %v771_v1, %v507_v4 }
 0xe50   :  { %v512_v8 = vsel %vm511_vm12, %v771_v1, %v508_v5 }
 0xe51   :  { %v517_v11 = vsel %vm514_vm13, %v516_v9, %v512_v8 }
 0xe52   :  { %v520_v13 = vmul.f32 %v517_v11, %v463_v48 }
 0xeaf   :  { %v523_v10 = vpop.permute.xlu1 %522 }
 0xeb0   :  { %v525_v12 = vmul.f32 %v523_v10, %v517_v11 }
 0xeb2   :  { %527 = vrot.lane.b32.xlu2 %v525_v12, %s915_s0 }
 0xf0c   :  { %v528_v14 = vpop.permute.xlu2 %527 }
 0xf0d   :  { %v530_v15 = vadd.f32 %v528_v14, %v520_v13 }
 0xf0f   :  { %772 = vtanh.f32 %v530_v15 }
 0xf15   :  { %v773_v16 = vpop.eup %772 }
 0xf16   :  { %533 = vrot.lane.b32.xlu0 %v773_v16, %s911_s23 }
 0xf88   :  { %v534_v17 = vpop.permute.xlu0 %533 }
 0xf89   :  { %v536_v18 = vmul.f32 %v534_v17, %v517_v11 }
 0xf8b   :  { %v546_v19 = vpack.c.bf16 %v536_v18, %v536_v18 }
 0xf8d   :  { %548 = vrot.lane.b32.xlu1 %v546_v19, %s915_s0 }
 0xfff   :  { %v549_v20 = vpop.permute.xlu1 %548 }
0x1000   :  { %702 = vmatmul.msk.bf16.vlgmr.msrb.gmra.mxu3 %vm53_vm0, %v549_v20 }
0x1083   :  { %v562_v23 = vpop.f32.mrf.mxu3 }
0x1084   :  { %v566_v24 = vadd.f32 %v562_v23, %v545_v22 }
0x1086   :  { %774 = vtanh.f32 %v566_v24  ;;  %v703_v28 = vmul.f32 -1.442695, %v566_v24 }
0x1088   :  { %776 = vpow2.f32 %v703_v28 }
0x108b   :  { %v564_v25 = vpop.f32.mrf.mxu3 }
0x108c   :  { %v775_v27 = vpop.eup %774 }
0x108d   :  { %589 = vrot.lane.b32.xlu2 %v775_v27, %s911_s23 }
0x108e   :  { %v777_v29 = vpop.eup %776 }
0x108f   :  { %v570_v30 = vadd.f32 1.0, %v777_v29 }
0x1091   :  { %778 = vrcp.f32 %v570_v30  ;;  %v582_v37 = vand.u32 2147483648, %v570_v30  ;;  %vm576_vm15 = vweird.f32 %v570_v30  ;;  %v580_v38 = vand.u32 2147483647, %v570_v30 }
0x1093   :  { %v583_v40 = vor.u32 1.1754944e-38, %v582_v37  ;;  %vm581_vm2 = vcmp.eq.f32.partialorder %v580_v38, 8.507059e+37 }
0x1095   :  { %270 = vrot.lane.b32.xlu2 %v982_v26, %s915_s0 }
0x1097   :  { %v779_v31 = vpop.eup %778 }
0x1098   :  { %v572_v32 = vmul.f32 %v779_v31, %v570_v30  ;;  %vm577_vm14 = vweird.f32 %v779_v31 }
0x1099   :  { %vm578_vm1 = vmor %vm576_vm15, %vm577_vm14 }
0x109a   :  { %v573_v34 = vsub.f32 1.0, %v572_v32 }
0x109c   :  { %v574_v35 = vmul.f32 %v779_v31, %v573_v34 }
0x109e   :  { %v575_v36 = vadd.f32 %v779_v31, %v574_v35 }
0x10a0   :  { %v579_v39 = vsel %vm578_vm1, %v779_v31, %v575_v36 }
0x10a1   :  { %v584_v26 = vsel %vm581_vm2, %v583_v40, %v579_v39 }
0x10a2   :  { %v587_v44 = vmul.f32 %v584_v26, %v530_v15 }
0x10e7   :  { %v590_v41 = vpop.permute.xlu2 %589 }
0x10e8   :  { %v592_v42 = vmul.f32 %v590_v41, %v584_v26 }
0x10ea   :  { %594 = vrot.lane.b32.xlu0 %v592_v42, %s915_s0 }
0x10ef   :  { %v271_v43 = vpop.permute.xlu2 %270 }
0x10f0   :  { %274 = vst.msk [vmem:[#allocation9 + $0x10] sm:$0xff] %vm53_vm0, %v271_v43 }
0x10f2   :  { %137 = vrot.lane.b32.xlu0 %v964_v33, %s915_s0 }
0x10fa   :  { %337 = vrot.lane.b32.xlu0 %v991_v55, %s915_s0 }
0x1102   :  { %538 = vrot.lane.b32.xlu0 %v536_v18, %s915_s0 }
0x115c   :  { %v595_v45 = vpop.permute.xlu0 %594 }
0x115d   :  { %v597_v46 = vadd.f32 %v595_v45, %v587_v44 }
0x115f   :  { %780 = vtanh.f32 %v597_v46 }
0x1164   :  { %v138_v47 = vpop.permute.xlu0 %137 }
0x1165   :  { %v781_v48 = vpop.eup %780  ;;  %140 = vst.msk [vmem:[#allocation9] sm:$0xff] %vm53_vm0, %v138_v47 }
0x1166   :  { %600 = vrot.lane.b32.xlu1 %v781_v48, %s911_s23 }
0x116c   :  { %v338_v49 = vpop.permute.xlu0 %337 }
0x116d   :  { %341 = vst.msk [vmem:[#allocation9 + $0x18] sm:$0xff] %vm53_vm0, %v338_v49 }
0x116e   :  { %203 = vrot.lane.b32.xlu1 %v973_v61, %s915_s0 }
0x1174   :  { %v539_v33 = vpop.permute.xlu0 %538 }
0x1175   :  { %542 = vst.msk [vmem:[#allocation9 + $0x30] sm:$0xff] %vm53_vm0, %v539_v33 }
0x1176   :  { %404 = vrot.lane.b32.xlu1 %v1000_v21, %s915_s0 }
0x117e   :  { %615 = vrot.lane.b32.xlu1 %v597_v46, %s916_s1 }
0x11d8   :  { %v601_v55 = vpop.permute.xlu1 %600 }
0x11d9   :  { %v603_v50 = vmul.f32 %v601_v55, %v584_v26 }
0x11db   :  { %605 = vrot.lane.b32.xlu2 %v603_v50, %s915_s0 }
0x11e0   :  { %v204_v52 = vpop.permute.xlu1 %203 }
0x11e1   :  { %207 = vst.msk [vmem:[#allocation9 + $0x8] sm:$0xff] %vm53_vm0, %v204_v52 }
0x11e3   :  { %471 = vrot.lane.b32.xlu2 %v1009_v51, %s915_s0 }
0x11e8   :  { %v405_v53 = vpop.permute.xlu1 %404 }
0x11e9   :  { %408 = vst.msk [vmem:[#allocation9 + $0x20] sm:$0xff] %vm53_vm0, %v405_v53 }
0x11f0   :  { %v616_v61 = vpop.permute.xlu1 %615 }
0x11f1   :  { %618 = vst.msk [vmem:[#allocation12] sm:$0xff] %vm53_vm0, %v616_v61 }
0x1235   :  { %v606_v21 = vpop.permute.xlu2 %605 }
0x1236   :  { %609 = vst.msk [vmem:[#allocation9 + $0x38] sm:$0xff] %vm53_vm0, %v606_v21 }
0x1237   :  { %613 = vst.msk [vmem:[#allocation10] sm:$0xff] %vm53_vm0, %v606_v21 }
0x1238   :  { %652 = dma.vmem_to_hbm [thread:$0]  %s648_s28, 128, %s650_s5, [#allocation11]  }
0x1239   :  { %663 = dma.vmem_to_hbm [thread:$0]  %s659_s7, 128, %s661_s10, [#allocation11]  }
0x123d   :  { %v472_v51 = vpop.permute.xlu2 %471 }
0x123e   :  { %475 = vst.msk [vmem:[#allocation9 + $0x28] sm:$0xff] %vm53_vm0, %v472_v51 }
0x123f   :  { %641 = dma.vmem_to_hbm [thread:$0]  %s634_s12, 1024, %s636_s3, [#allocation6], %s920_s4, %s920_s4, %s921_s15  }
0x1240   :  { %906 = dma.done.wait [#allocation6], 1024  }
0x1241   :  { %907 = vsyncadd [#allocation6], 4294966272 }
0x1242   :  { %908 = dma.done.wait [#allocation11], 256  }
0x1243   :  { %909 = vsyncadd [#allocation11], 4294967040 }
0x1244   :  { %676 = vsyncpa [#allocation5], 1 }
0x1245   :  { %677 = vsyncpa [#allocation8], 1 }
0x1246   :  { %678 = vsyncpa [#allocation6], 1 }
0x1247   :  { %679 = vsyncpa [#allocation11], 1 }

</bundles_post_ra>
